<compile_context>
chip_gen: v6e
topology: v6e:2x2x1
jax: 0.10.0
libtpu: 0.0.40
codegen_flags: <defaults>
</compile_context>

<pallas_src>
import jax
import jax.numpy as jnp
from jax.experimental import pallas as pl
from jax.experimental.pallas import tpu as pltpu


# ---------------------------------------------------------------------------
# Pallas kernel: p_model scoring + cross-entropy(target=class 0) partial sums
# ---------------------------------------------------------------------------
def _negnce_kernel(len_ref, seq_ref, sel_ref, out_ref):
    tb, L, _ = seq_ref.shape

    seq_len = len_ref[...]                                   # (TB,1,1) f32
    inv_len = pl.reciprocal(seq_len, approx=True)            # (TB,1,1)

    # Validity mask built in-kernel: position l is valid iff l < seq_len[b].
    pos = jax.lax.broadcasted_iota(jnp.int32, (tb, 1, L), 2)
    valid = pos < seq_len.astype(jnp.int32)                  # (TB,1,L)
    w = jnp.where(valid, inv_len, 0.0).astype(seq_ref.dtype)  # (TB,1,L)

    # Masked mean-pool over L on the MXU: (TB,1,L) x (TB,L,H) -> (TB,1,H).
    seq_repr = jax.lax.dot_general(
        w, seq_ref[...],
        dimension_numbers=(((2,), (1,)), ((0,), (0,))),
        preferred_element_type=jnp.float32)

    # Candidate logits over H on the MXU: (TB,1,H) x (TB,K+1,H) -> (TB,1,K+1).
    logits = jax.lax.dot_general(
        seq_repr.astype(sel_ref.dtype), sel_ref[...],
        dimension_numbers=(((2,), (2,)), ((0,), (0,))),
        preferred_element_type=jnp.float32)

    # Cross-entropy with target class 0, logsumexp form (no divides).
    m = jnp.max(logits, axis=-1, keepdims=True)              # (TB,1,1)
    lse = m + jnp.log(jnp.sum(jnp.exp(logits - m), axis=-1, keepdims=True))
    per_row = lse - logits[:, :, 0:1]                        # (TB,1,1)
    partial = jnp.sum(per_row)                               # scalar f32

    # Lane-dense, unmasked store of this tile's partial sum.
    out_ref[...] = jnp.full(out_ref.shape, partial, dtype=out_ref.dtype)


def _pick_block_b(B, L, H, kp1, itemsize, budget_bytes=8 << 20):
    """Largest divisor of B whose double-buffered inputs fit the VMEM budget."""
    per_row = 2 * (L * H + kp1 * H) * itemsize + 2 * 4       # 2x buffering
    tb = int(max(1, min(B, budget_bytes // max(per_row, 1))))
    while B % tb:
        tb -= 1
    return tb


def negnce_loss_pallas(seq_emb, seq_len, sel_emb, *, block_b=None):
    """mean_b[ logsumexp_j <pool(seq_emb_b), sel_emb_b[j]> - <., sel_emb_b[0]> ]."""
    B, L, H = seq_emb.shape
    kp1 = sel_emb.shape[1]
    tb = block_b or _pick_block_b(B, L, H, kp1, seq_emb.dtype.itemsize)
    assert B % tb == 0, (B, tb)
    nb = B // tb

    seq_len_f = seq_len.astype(jnp.float32).reshape(B, 1, 1)

    partials = pl.pallas_call(
        _negnce_kernel,
        out_shape=jax.ShapeDtypeStruct((nb, 8, 128), jnp.float32),
        grid=(nb,),
        in_specs=[
            pl.BlockSpec((tb, 1, 1), lambda i: (i, 0, 0)),     # seq lengths
            pl.BlockSpec((tb, L, H), lambda i: (i, 0, 0)),     # seq embeddings
            pl.BlockSpec((tb, kp1, H), lambda i: (i, 0, 0)),   # [pos, negs] embs
        ],
        out_specs=pl.BlockSpec((1, 8, 128), lambda i: (i, 0, 0)),
        compiler_params=pltpu.CompilerParams(
            dimension_semantics=("parallel",)),
    )(seq_len_f, seq_emb, sel_emb)

    return jnp.sum(partials[:, 0, 0]) / B


# ---------------------------------------------------------------------------
# Glue (plain JAX): synthetic q_model + negative sampling + embedding gathers
# ---------------------------------------------------------------------------
def q_model_logits(q_item_emb, item_seq, item_seq_len):
    """Synthetic q_model.calculate_logits: masked mean-pool dotted with items."""
    L = item_seq.shape[1]
    seq_q = jnp.take(q_item_emb, item_seq, axis=0)                       # (B,L,Hq)
    mask = (jnp.arange(L)[None, :] < item_seq_len[:, None]).astype(jnp.float32)
    pooled = (jnp.sum(seq_q * mask[:, :, None], axis=1)
              / item_seq_len[:, None].astype(jnp.float32))               # (B,Hq)
    return pooled @ q_item_emb.T                                         # (B,n_items)


def sample_negatives(key, noise_logits, target_id, K):
    """torch.multinomial(softmax(noise_logits*one_hot)*one_hot, K, repl=False).

    Restricted to non-target items, that distribution is softmax(noise_logits)
    over the non-target set, so Gumbel-top-k on the target-masked logits is an
    exact equivalent of sampling-without-replacement."""
    B, n_items = noise_logits.shape
    is_target = jnp.arange(n_items)[None, :] == target_id[:, None]
    g = jax.random.gumbel(key, (B, n_items), dtype=jnp.float32)
    scores = jnp.where(is_target, -jnp.inf, noise_logits + g)
    _, neg_items = jax.lax.top_k(scores, K)
    return neg_items


def negnce_forward(key, p_item_emb, q_item_emb, item_seq, item_seq_len,
                   target_id, time_seq, time_interval_seq, target_time, K,
                   *, block_b=None):
    # TODO(synk): time_seq / time_interval_seq / target_time are accepted for
    # interface parity only; the reference passes them as None into both
    # models and the synthetic p_model/q_model here ignore them.
    del time_seq, time_interval_seq, target_time

    noise_logits = q_model_logits(q_item_emb, item_seq, item_seq_len)
    neg_items = sample_negatives(key, noise_logits, target_id, K)
    pos_neg_items = jnp.concatenate([target_id[:, None], neg_items], 1)  # (B,K+1)

    # TODO(synk): fuse these gathers into the kernel (scalar-prefetch indices
    # + manual DMA of embedding rows) to halve HBM traffic for (B,L,H).
    seq_emb = jnp.take(p_item_emb, item_seq, axis=0)                     # (B,L,H)
    sel_emb = jnp.take(p_item_emb, pos_neg_items, axis=0)                # (B,K+1,H)

    return negnce_loss_pallas(seq_emb, item_seq_len, sel_emb, block_b=block_b)


# ---------------------------------------------------------------------------
# Pure-JAX reference of the in-kernel part (for a correctness check)
# ---------------------------------------------------------------------------
def _negnce_loss_ref(seq_emb, item_seq_len, sel_emb):
    B, L, _ = seq_emb.shape
    mask = (jnp.arange(L)[None, :] < item_seq_len[:, None]).astype(jnp.float32)
    pooled = (jnp.sum(seq_emb * mask[:, :, None], axis=1)
              / item_seq_len[:, None].astype(jnp.float32))
    logits = jnp.einsum('bh,bjh->bj', pooled, sel_emb)
    m = jnp.max(logits, axis=-1, keepdims=True)
    lse = m[:, 0] + jnp.log(jnp.sum(jnp.exp(logits - m), axis=-1))
    return jnp.mean(lse - logits[:, 0])


if __name__ == "__main__":
    B, L, H = 8, 8, 32
    n_items = 64
    K = 8

    root = jax.random.PRNGKey(0)
    k_p, k_q, k_seq, k_len, k_tgt, k_smp = jax.random.split(root, 6)

    # Deterministic synthetic p_model / q_model parameters (embedding tables).
    p_item_emb = (jax.random.normal(k_p, (n_items, H), jnp.float32)
                  / jnp.sqrt(jnp.float32(H)))
    q_item_emb = (jax.random.normal(k_q, (n_items, H), jnp.float32)
                  / jnp.sqrt(jnp.float32(H)))

    item_seq = jax.random.randint(k_seq, (B, L), 1, n_items, dtype=jnp.int32)
    item_seq_len = jax.random.randint(k_len, (B,), 1, L + 1, dtype=jnp.int32)
    target_id = jax.random.randint(k_tgt, (B,), 1, n_items, dtype=jnp.int32)

    # Time features (unused by the synthetic models, kept for interface parity).
    time_seq = jnp.zeros((B, L), jnp.float32)
    time_interval_seq = jnp.zeros((B, L), jnp.float32)
    target_time = jnp.zeros((B,), jnp.float32)

    loss = negnce_forward(k_smp, p_item_emb, q_item_emb, item_seq, item_seq_len,
                          target_id, time_seq, time_interval_seq, target_time,
                          K, block_b=4)                      # 2 batch tiles
    loss = jax.block_until_ready(loss)
    assert jnp.isfinite(loss), "loss is not finite"

    # Pure-JAX reference on the identical sampled candidates.
    noise_logits = q_model_logits(q_item_emb, item_seq, item_seq_len)
    neg_items = sample_negatives(k_smp, noise_logits, target_id, K)
    pos_neg_items = jnp.concatenate([target_id[:, None], neg_items], 1)
    seq_emb = jnp.take(p_item_emb, item_seq, axis=0)
    sel_emb = jnp.take(p_item_emb, pos_neg_items, axis=0)
    ref = _negnce_loss_ref(seq_emb, item_seq_len, sel_emb)
    assert jnp.allclose(loss, ref, rtol=5e-2, atol=1e-2), (float(loss), float(ref))

    print("KERNEL_OK")
</pallas_src>

<mosaic_0001>
module attributes {stable_mosaic.version = 11 : i64} {
  func.func @_negnce_kernel(%arg0: i32, %arg1: memref<4x1x1xf32, #tpu.memory_space<vmem>>, %arg2: memref<4x8x32xf32, #tpu.memory_space<vmem>>, %arg3: memref<4x9x32xf32, #tpu.memory_space<vmem>>, %arg4: memref<1x8x128xf32, #tpu.memory_space<vmem>>) attributes {dimension_semantics = [#tpu.dimension_semantics<parallel>], iteration_bounds = array<i64: 2>, scalar_prefetch = 0 : i64, scratch_operands = 0 : i64, tpu.core_type = #tpu.core_type<tc>, window_params = [{transform_indices = @transform_0, window_bounds = array<i64: 4, 1, 1>}, {transform_indices = @transform_1, window_bounds = array<i64: 4, 8, 32>}, {transform_indices = @transform_2, window_bounds = array<i64: 4, 9, 32>}, {transform_indices = @transform_3, window_bounds = array<i64: 1, 8, 128>}]} {
    %c0 = arith.constant 0 : index
    %c0_0 = arith.constant 0 : index
    %c0_1 = arith.constant 0 : index
    %0 = vector.load %arg1[%c0, %c0_0, %c0_1] : memref<4x1x1xf32, #tpu.memory_space<vmem>>, vector<4x1x1xf32>
    %1 = tpu.reciprocal %0 {approx = true} : vector<4x1x1xf32> -> vector<4x1x1xf32>
    %2 = tpu.iota {dimensions = array<i32: 2>} : vector<4x1x8xi32>
    %3 = arith.fptosi %0 : vector<4x1x1xf32> to vector<4x1x1xi32>
    %4 = vector.broadcast %3 : vector<4x1x1xi32> to vector<4x1x8xi32>
    %5 = arith.cmpi slt, %2, %4 : vector<4x1x8xi32>
    %cst = arith.constant 0.000000e+00 : f32
    %6 = vector.shape_cast %1 : vector<4x1x1xf32> to vector<4x1x1xf32>
    %7 = vector.broadcast %6 : vector<4x1x1xf32> to vector<4x1x8xf32>
    %8 = vector.broadcast %cst : f32 to vector<4x1x8xf32>
    %9 = arith.select %5, %7, %8 : vector<4x1x8xi1>, vector<4x1x8xf32>
    %c0_2 = arith.constant 0 : index
    %c0_3 = arith.constant 0 : index
    %c0_4 = arith.constant 0 : index
    %10 = vector.load %arg2[%c0_2, %c0_3, %c0_4] : memref<4x8x32xf32, #tpu.memory_space<vmem>>, vector<4x8x32xf32>
    %cst_5 = arith.constant dense<0.000000e+00> : vector<4x1x32xf32>
    %11 = tpu.matmul %9, %10, %cst_5 {dimension_numbers = #tpu.dot_dimension_numbers<[2], [1], [1], [2], [0, 0, 0, 1, 1, 2], [0], [0]>} : vector<4x1x8xf32>, vector<4x8x32xf32>, vector<4x1x32xf32> -> vector<4x1x32xf32>
    %c0_6 = arith.constant 0 : index
    %c0_7 = arith.constant 0 : index
    %c0_8 = arith.constant 0 : index
    %12 = vector.load %arg3[%c0_6, %c0_7, %c0_8] : memref<4x9x32xf32, #tpu.memory_space<vmem>>, vector<4x9x32xf32>
    %cst_9 = arith.constant dense<0.000000e+00> : vector<4x1x9xf32>
    %13 = tpu.matmul %11, %12, %cst_9 {dimension_numbers = #tpu.dot_dimension_numbers<[2], [2], [1], [1], [0, 0, 0, 1, 1, 1], [0], [0]>} : vector<4x1x32xf32>, vector<4x9x32xf32>, vector<4x1x9xf32> -> vector<4x1x9xf32>
    %cst_10 = arith.constant dense<0xFF800000> : vector<4x1xf32>
    %14 = vector.multi_reduction <maximumf>, %13, %cst_10 [2] : vector<4x1x9xf32> to vector<4x1xf32>
    %15 = vector.shape_cast %14 : vector<4x1xf32> to vector<4x1x1xf32>
    %16 = vector.broadcast %15 : vector<4x1x1xf32> to vector<4x1x9xf32>
    %17 = arith.subf %13, %16 : vector<4x1x9xf32>
    %18 = math.exp %17 : vector<4x1x9xf32>
    %cst_11 = arith.constant dense<0.000000e+00> : vector<4x1xf32>
    %19 = vector.multi_reduction <add>, %18, %cst_11 [2] : vector<4x1x9xf32> to vector<4x1xf32>
    %20 = vector.shape_cast %19 : vector<4x1xf32> to vector<4x1x1xf32>
    %21 = math.log %20 : vector<4x1x1xf32>
    %22 = arith.addf %15, %21 : vector<4x1x1xf32>
    %23 = vector.extract_strided_slice %13 {offsets = [0, 0, 0], sizes = [4, 1, 1], strides = [1, 1, 1]} : vector<4x1x9xf32> to vector<4x1x1xf32>
    %24 = arith.subf %22, %23 : vector<4x1x1xf32>
    %25 = vector.shape_cast %24 : vector<4x1x1xf32> to vector<1x4x1x1xf32>
    %cst_12 = arith.constant dense<0.000000e+00> : vector<1xf32>
    %26 = vector.multi_reduction <add>, %25, %cst_12 [1, 2, 3] : vector<1x4x1x1xf32> to vector<1xf32>
    %27 = vector.shape_cast %26 : vector<1xf32> to vector<1x1x1x1xf32>
    %28 = vector.extract %27[0, 0, 0, 0] : f32 from vector<1x1x1x1xf32>
    %29 = vector.broadcast %28 : f32 to vector<1x8x128xf32>
    %c0_13 = arith.constant 0 : index
    %c0_14 = arith.constant 0 : index
    %c0_15 = arith.constant 0 : index
    %30 = vector.load %arg4[%c0_13, %c0_14, %c0_15] : memref<1x8x128xf32, #tpu.memory_space<vmem>>, vector<1x8x128xf32>
    tpu.vector_store %arg4[%c0_13, %c0_14, %c0_15], %29 {strides = array<i32>} : memref<1x8x128xf32, #tpu.memory_space<vmem>>, vector<1x8x128xf32>,
    return
  }
  func.func @transform_0(%arg0: i32) -> (i32, i32, i32) {
    %c0_i32 = arith.constant 0 : i32
    %c0_i32_0 = arith.constant 0 : i32
    %c0_i32_1 = arith.constant 0 : i32
    return %arg0, %c0_i32, %c0_i32_0 : i32, i32, i32
  }
  func.func @transform_1(%arg0: i32) -> (i32, i32, i32) {
    %c0_i32 = arith.constant 0 : i32
    %c0_i32_0 = arith.constant 0 : i32
    %c0_i32_1 = arith.constant 0 : i32
    return %arg0, %c0_i32, %c0_i32_0 : i32, i32, i32
  }
  func.func @transform_2(%arg0: i32) -> (i32, i32, i32) {
    %c0_i32 = arith.constant 0 : i32
    %c0_i32_0 = arith.constant 0 : i32
    %c0_i32_1 = arith.constant 0 : i32
    return %arg0, %c0_i32, %c0_i32_0 : i32, i32, i32
  }
  func.func @transform_3(%arg0: i32) -> (i32, i32, i32) {
    %c0_i32 = arith.constant 0 : i32
    %c0_i32_0 = arith.constant 0 : i32
    %c0_i32_1 = arith.constant 0 : i32
    return %arg0, %c0_i32, %c0_i32_0 : i32, i32, i32
  }
}

</mosaic_0001>

<bundles_post_ra>
// kernel: tpu_custom_call.1
= control target key start
LH: loop header
LB: loop body
LE: loop exit
PB: predicated region body
PF: predicated region fallthrough
CT: control target
= control target key end

     0   :  { %8 = vsyncpa [#allocation3], 0  ;;  %s1544_s0 = inlined_call_operand.vmem [shape: f32[8,1,1], index: 0, kind: input, shape index: {}]   ;;  %s1545_s1 = inlined_call_operand.vmem [shape: f32[8,8,32], index: 1, kind: input, shape index: {}]   ;;  %s1546_s2 = inlined_call_operand.vmem [shape: f32[8,9,32], index: 2, kind: input, shape index: {}]   ;;  %s1547_s3 = inlined_call_operand.hbm [shape: f32[2,8,128], index: 3, kind: output, shape index: {}]  }
   0x1   :  { %10 = vsyncpa [#allocation3 + $0x1], 0  ;;  %s1353_s12 = smov 0   ;;  %s1355_s13 = smov 0  }
   0x2   :  { %s1357_s14 = smov 0   ;;  %s1359_s15 = smov 0  }
   0x3 LB: > { %s1374_s16 = sadd.s32 4294967295, %s1327_s15   ;;  %s1089_s17 = sadd.s32 4294967294, %s1327_s15   ;;  %s1327_s15 = sphi %s1359_s15, %s1553_s15   ;;  %s1323_s14 = sphi %s1357_s14, %s1552_s14   ;;  %s1319_s13 = sphi %s1355_s13, %s1551_s13   ;;  %s1315_s12 = sphi %s1353_s12, %s1550_s12  }
   0x4   : > { %s1378_s18 = sadd.s32 1, %s1327_s15   ;;  %s101_s19 = sadd.s32 1, %s1323_s14 }
   0x5   : > { %s98_s20 = ssub.s32 %s1327_s15, %s1378_s18  ;;  %p111_p0 = scmp.ne.s32.totalorder %s1323_s14, %s1319_s13 }
   0x6   : > { %p99_p1 = scmp.eq.s32.totalorder %s98_s20, 0  ;;  %p112_p2 = scmp.eq.s32.totalorder %s1374_s16, 1 }
   0x7   : > { %p117_p3 = scmp.ne.s32.totalorder %s1319_s13, %s1315_s12  ;;  %p118_p4 = scmp.eq.s32.totalorder %s1089_s17, 1 }
   0x8   : > { %s1389_s21 = scalar_select %p99_p1, %s1323_s14, %s101_s19  }
   0x9   : > { %p1391_p5 = por %p112_p2, %p111_p0  ;;  %p1395_p6 = por %p118_p4, %p117_p3 }
   0xa   : > { %p1092_p7 = scmp.ge.s32.totalorder %s1327_s15, 1  ;;  %p163_p8 = scmp.lt.s32.totalorder %s1327_s15, 3 }
   0xc   : > { %p164_p9 = pnand %p1092_p7, %p163_p8 }
   0xd   : > { %s1094_s24 = sshll.u32 (!%p164_p9), %s1374_s16, 2  ;;  %s194_s9 = sand.u32 (!%p164_p9), 1, %s1319_s13  }
   0xe   : > { %167 = sbr.rel (%p164_p9) target bundleno = 1095 (0x447), region = 32  ;;  %p198_p10 = scmp.lt.s32.totalorder (!%p164_p9), %s1094_s24, 7 }
   0xf   : > { %s1093_s10 = sshll.u32 (!%p164_p9), %s194_s9, 3  ;;  %s1117_s19 = sshll.u32 (!%p164_p9), %s1374_s16, 7 }
  0x10   : > { %s196_s11 = scalar_lea.vmem (!%p164_p9), [#allocation2], %s1093_s10  ;;  %s1007_s26 = scalar_lea.hbm (!%p164_p9), %s1547_s3, %s1117_s19 }
  0x11   : > { %s1009_s17 = sshll.u32 (!%p164_p9), %s196_s11, 4  ;;  %s1332_s29 = smov (!%p164_p9), [#allocation2]   ;;  %s1506_s17 = int_to_ptr.vmem [resolvable:$true] %s1009_s17 }
  0x12   : > { %s1271_s16 = sshll.u32 (!%p164_p9), %s1332_s29, 4  ;;  %s1272_s16 = int_to_ptr.vmem [resolvable:$false] %s1271_s16 }
  0x13   : > { %v1329_v0 = vmov 0   ;;  %s1555_s24 = smov (!%p198_p10, %s1094_s24), 7  ;;  %v1330_v10 = vmov 0.0   ;;  %vm1331_vm0 = vmmov 0   ;;  %v223_v20 = vlaneseq  ;;  %s1273_s30 = scalar_lea.vmem %s1272_s16, 256 }
  0x14   : > { %1242 = vset.pattern.permute.xlu1 %v1329_v0  ;;  %1241 = vset.pattern.permute.xlu0 %v1329_v0  ;;  %s200_s27 = scalar_lea.vmem %s1544_s0, %s1555_s24  ;;  %s1096_s28 = sshll.u32 %s1555_s24, 3  ;;  %vm305_vm2 = vcmask 64512   ;;  %vm606_vm5 = vcmask 261120   ;;  %vm923_vm7 = vcmask 65536   ;;  %vm976_vm8 = vcmask 0  }
  0x15   : > { %v216_v1 = vld [vmem:[%s200_s27 + $0x1] sm:$0x1]  ;;  %v215_v3 = vld [vmem:[%s200_s27] sm:$0x1]  ;;  %v217_v4 = vld [vmem:[%s200_s27 + $0x2] sm:$0x1]  ;;  %s1412_s4 = scalar_lea.vmem %s1545_s1, %s1096_s28  ;;  %1141 = vmatprep.subr.mxu0 %v1330_v10  ;;  %1146 = vmatprep.subr.mxu1 %v1330_v10  ;;  %p1274_p0 = scmp.lt.s32.totalorder %s1506_s17, %s1272_s16 }
  0x16   : > { %v1191_v2 = vtrunc.f32 %v216_v1  ;;  %v1189_v5 = vtrunc.f32 %v215_v3  ;;  %1243 = vrcp.f32 %v216_v1  ;;  %v218_v8 = vld [vmem:[%s200_s27 + $0x3] sm:$0x1]  ;;  %v1193_v9 = vtrunc.f32 %v217_v4  ;;  %v302_v12 = vld [vmem:[%s1412_s4 + $0x8] sm:$0xff]  ;;  %1143 = vmatprep.mubr.msk.f32.mxu0 %vm1331_vm0, %v1330_v10  ;;  %1148 = vmatprep.mubr.msk.f32.mxu1 %vm1331_vm0, %v1330_v10  ;;  %s1120_s5 = sshll.u32 %s1555_s24, 4  ;;  %v304_v32 = vld [vmem:[%s1412_s4 + $0x18] sm:$0xff]  ;;  %s996_s27 = scalar_lea.sflag [#allocation3], %s194_s9 }
  0x17   : > { %1245 = vrcp.f32 %v215_v3  ;;  %v301_v11 = vld [vmem:[%s1412_s4] sm:$0xff]  ;;  %1147 = vmatpush3.msra.mxu1 %v302_v12  ;;  %v1195_v17 = vtrunc.f32 %v218_v8  ;;  %v233_v21 = vshrl.u32 %v223_v20, 7  ;;  %v224_v26 = vand.u32 127, %v223_v20  ;;  %v303_v34 = vld [vmem:[%s1412_s4 + $0x10] sm:$0xff]  ;;  %s1431_s8 = scalar_lea.vmem %s1546_s2, %s1120_s5  ;;  %s1267_s28 = scalar_lea.vmem %s1506_s17, 128 }
  0x18   : > { %v1192_v6 = vcvt.f32.s32 %v1191_v2  ;;  %v1190_v7 = vcvt.f32.s32 %v1189_v5  ;;  %1247 = vrcp.f32 %v217_v4  ;;  %1142 = vmatpush3.msra.mxu0 %v301_v11  ;;  %v1194_v16 = vcvt.f32.s32 %v1193_v9  ;;  %1156 = vmatprep.subr.mxu1 %v1330_v10  ;;  %v599_v41 = vld [vmem:[%s1431_s8 + $0x8] sm:$0x1]  ;;  %v601_v46 = vld [vmem:[%s1431_s8 + $0x18] sm:$0x1]  ;;  %v598_v47 = vld [vmem:[%s1431_s8] sm:$0xff]  ;;  %p1268_p11 = scmp.ne.s32.totalorder %s1506_s17, %s1267_s28  ;;  %p1275_p1 = scmp.lt.s32.totalorder %s1273_s30, %s1267_s28 }
  0x19   : > { %1249 = vrcp.f32 %v218_v8  ;;  %1151 = vmatprep.subr.mxu0 %v1330_v10  ;;  %v1196_v19 = vcvt.f32.s32 %v1195_v17  ;;  %v234_v22 = vsub.s32 0, %v233_v21  ;;  %v600_v49 = vld [vmem:[%s1431_s8 + $0x10] sm:$0xff]  ;;  %v605_v50 = vld [vmem:[%s1431_s8 + $0x38] sm:$0x1]  ;;  %v603_v52 = vld [vmem:[%s1431_s8 + $0x28] sm:$0x1] }
  0x1a   : > { %237 = vperm.xlu1 %1242, %v1192_v6   ;;  %230 = vperm.xlu0 %1241, %v1190_v7   ;;  %v604_v56 = vld [vmem:[%s1431_s8 + $0x30] sm:$0xff]  ;;  %v602_v57 = vld [vmem:[%s1431_s8 + $0x20] sm:$0xff]  ;;  %p1269_p12 = pnand %p1268_p11, %p1391_p5  ;;  %p1276_p2 = por %p1275_p1, %p1274_p0 }
  0x1c   : > { %p1270_p13 = pneg %p1269_p12 }
  0x1e   : > { %p1277_p3 = pnand %p1276_p2, %p1270_p13 }
  0x23   : > { %v1244_v13 = vpop.eup %1243 }
  0x24   : > { %v1246_v14 = vpop.eup %1245  ;;  %272 = vperm.xlu1 %1242, %v1244_v13  }
  0x25   : > { %v1248_v15 = vpop.eup %1247  ;;  %263 = vperm.xlu0 %1241, %v1246_v14  }
  0x26   : > { %v1250_v18 = vpop.eup %1249 }
  0x28   : > { %281 = vperm.xlu1 %1242, %v1248_v15  }
  0x29   : > { %244 = vperm.xlu0 %1241, %v1194_v16  }
  0x2c   : > { %290 = vperm.xlu1 %1242, %v1250_v18  }
  0x2d   : > { %251 = vperm.xlu0 %1241, %v1196_v19  }
  0x95   : > { %v238_v23 = vpop.permute.xlu1 %237  ;;  %v231_v24 = vpop.permute.xlu0 %230 }
  0x96   : > { %v242_v25 = vrot.slane %v238_v23, %v234_v22  ;;  %v235_v27 = vrot.slane %v231_v24, %v234_v22 }
  0x98   : > { %vm258_vm1 = vcmp.lt.s32.totalorder %v224_v26, %v242_v25  ;;  %vm257_vm3 = vcmp.lt.s32.totalorder %v224_v26, %v235_v27 }
  0x9f   : > { %v273_v28 = vpop.permute.xlu1 %272 }
  0xa0   : > { %v278_v29 = vrot.slane %v273_v28, %v234_v22  ;;  %v264_v30 = vpop.permute.xlu0 %263 }
  0xa1   : > { %v269_v31 = vrot.slane %v264_v30, %v234_v22 }
  0xa2   : > { %v298_v33 = vsel %vm258_vm1, %v278_v29, 0.0 }
  0xa3   : > { %v297_v35 = vsel %vm257_vm3, %v269_v31, 0.0  ;;  %1149 = vmatmul.mubr.msk.f32.vlgmr.msra.gmra.mxu1 %vm305_vm2, %v298_v33  ;;  %v282_v36 = vpop.permute.xlu1 %281 }
  0xa4   : > { %v287_v37 = vrot.slane %v282_v36, %v234_v22  ;;  %1144 = vmatmul.mubr.msk.f32.vlgmr.msra.gmra.mxu0 %vm305_vm2, %v297_v35  ;;  %v245_v38 = vpop.permute.xlu0 %244  ;;  %1157 = vmatpush3.msra.mxu1 %v304_v32 }
  0xa5   : > { %v249_v39 = vrot.slane %v245_v38, %v234_v22  ;;  %1152 = vmatpush3.msra.mxu0 %v303_v34  ;;  %1153 = vmatprep.mubr.msk.f32.mxu0 %vm1331_vm0, %v1330_v10 }
  0xa6   : > { %1158 = vmatprep.mubr.msk.f32.mxu1 %vm1331_vm0, %v1330_v10  ;;  %1161 = vmatprep.subr.mxu0 %v1330_v10 }
  0xa7   : > { %vm259_vm4 = vcmp.lt.s32.totalorder %v224_v26, %v249_v39  ;;  %v291_v40 = vpop.permute.xlu1 %290  ;;  %1168 = vmatprep.subr.mxu1 %v1330_v10 }
  0xa8   : > { %v299_v42 = vsel %vm259_vm4, %v287_v37, 0.0  ;;  %v296_v43 = vrot.slane %v291_v40, %v234_v22  ;;  %v252_v44 = vpop.permute.xlu0 %251 }
  0xa9   : > { %v256_v45 = vrot.slane %v252_v44, %v234_v22  ;;  %1154 = vmatmul.mubr.msk.f32.vlgmr.msra.gmra.mxu0 %vm305_vm2, %v299_v42 }
  0xaa   : > { %1162 = vmatpush3.xpose.msk.msra.mxu0 %vm606_vm5, %v599_v41  ;;  %1165 = vmatprep.mubr.msk.f32.mxu0 %vm1331_vm0, %v1330_v10 }
  0xab   : > { %vm260_vm6 = vcmp.lt.s32.totalorder %v224_v26, %v256_v45  ;;  %1163 = vmatprep.subr.mxu0 %v1330_v10 }
  0xac   : > { %v300_v48 = vsel %vm260_vm6, %v296_v43, 0.0 }
  0xad   : > { %1159 = vmatmul.mubr.msk.f32.vlgmr.msra.gmra.mxu1 %vm305_vm2, %v300_v48 }
  0xae   : > { %1169 = vmatpush3.xpose.msk.msra.mxu1 %vm606_vm5, %v601_v46  ;;  %1164 = vmatpush3.xpose.msk.msra.mxu0 %vm606_vm5, %v598_v47 }
  0xaf   : > { %1170 = vmatprep.subr.mxu1 %v1330_v10  ;;  %1172 = vmatprep.mubr.msk.f32.mxu1 %vm1331_vm0, %v1330_v10 }
  0xb0   : > { %1175 = vmatprep.subr.mxu0 %v1330_v10 }
  0xb2   : > { %1171 = vmatpush3.xpose.msk.msra.mxu1 %vm606_vm5, %v600_v49 }
  0xb3   : > { %1182 = vmatprep.subr.mxu1 %v1330_v10 }
 0x163   : > { %v448_v51 = vpop.f32.mrf.mxu1 }
 0x164   : > { %v375_v53 = vpop.f32.mrf.mxu0  ;;  %1173 = vmatmul.mubr.msk.f32.vlgmr.msra.gmra.mxu1 %vm606_vm5, %v448_v51 }
 0x165   : > { %1166 = vmatmul.mubr.msk.f32.vlgmr.msra.gmra.mxu0 %vm606_vm5, %v375_v53  ;;  %v1150_v54 = vpop.f32.mrf.mxu1  ;;  %1183 = vmatpush3.xpose.msk.msra.mxu1 %vm606_vm5, %v605_v50 }
 0x166   : > { %1176 = vmatpush3.xpose.msk.msra.mxu0 %vm606_vm5, %v603_v52  ;;  %v1145_v55 = vpop.f32.mrf.mxu0  ;;  %1184 = vmatprep.subr.mxu1 %v1330_v10 }
 0x167   : > { %1177 = vmatprep.subr.mxu0 %v1330_v10  ;;  %1179 = vmatprep.mubr.msk.f32.mxu0 %vm1331_vm0, %v1330_v10 }
 0x168   : > { %1186 = vmatprep.mubr.msk.f32.mxu1 %vm1331_vm0, %v1330_v10 }
 0x169   : > { %v521_v58 = vpop.f32.mrf.mxu0  ;;  %1185 = vmatpush3.xpose.msk.msra.mxu1 %vm606_vm5, %v604_v56 }
 0x16a   : > { %1178 = vmatpush3.xpose.msk.msra.mxu0 %vm606_vm5, %v602_v57 }
 0x16b   : > { %v1155_v59 = vpop.f32.mrf.mxu0 }
 0x16d   : > { %1180 = vmatmul.mubr.msk.f32.vlgmr.msra.gmra.mxu0 %vm606_vm5, %v521_v58  ;;  %v594_v60 = vpop.f32.mrf.mxu1 }
 0x16e   : > { %1187 = vmatmul.mubr.msk.f32.vlgmr.msra.gmra.mxu1 %vm606_vm5, %v594_v60 }
 0x16f   : > { %v1160_v61 = vpop.f32.mrf.mxu1 }
 0x224   : > { %v1476_v62 = vpop.f32.mrf.mxu1 }
 0x225   : > { %v1478_v63 = vpop.f32.mrf.mxu0  ;;  %v927_v0 = vsel %vm923_vm7, %v1476_v62, -inf }
 0x226   : > { %v924_v1 = vsel %vm923_vm7, %v1478_v63, -inf  ;;  %928 = vmax.xlane.f32.xlu1 %v927_v0  ;;  %v1174_v2 = vpop.f32.mrf.mxu1 }
 0x227   : > { %925 = vmax.xlane.f32.xlu0 %v924_v1  ;;  %v1167_v3 = vpop.f32.mrf.mxu0 }
 0x22d   : > { %v1484_v4 = vpop.f32.mrf.mxu0 }
 0x22e   : > { %v930_v5 = vsel %vm923_vm7, %v1484_v4, -inf  ;;  %v1488_v6 = vpop.f32.mrf.mxu1 }
 0x22f   : > { %931 = vmax.xlane.f32.xlu0 %v930_v5  ;;  %v1181_v7 = vpop.f32.mrf.mxu0  ;;  %v933_v9 = vsel %vm923_vm7, %v1488_v6, -inf }
 0x230   : > { %v1188_v8 = vpop.f32.mrf.mxu1 }
 0x233   : > { %934 = vmax.xlane.f32.xlu0 %v933_v9 }
 0x2af   : > { %v929_v10 = vpop.xlane.xlu1 %928 }
 0x2b0   : > { %v937_v11 = vsub.f32 %v1476_v62, %v929_v10  ;;  %v926_v12 = vpop.xlane.xlu0 %925 }
 0x2b1   : > { %v936_v13 = vsub.f32 %v1478_v63, %v926_v12 }
 0x2b2   : > { %v942_v14 = vmul.f32 1.442695, %v937_v11 }
 0x2b3   : > { %v940_v15 = vmul.f32 1.442695, %v936_v13 }
 0x2b4   : > { %1251 = vpow2.f32 %v942_v14 }
 0x2b5   : > { %1253 = vpow2.f32 %v940_v15 }
 0x2b8   : > { %v932_v16 = vpop.xlane.xlu0 %931 }
 0x2b9   : > { %v938_v17 = vsub.f32 %v1484_v4, %v932_v16 }
 0x2bb   : > { %v944_v18 = vmul.f32 1.442695, %v938_v17 }
 0x2bc   : > { %v935_v19 = vpop.xlane.xlu0 %934 }
 0x2bd   : > { %1255 = vpow2.f32 %v944_v18  ;;  %v939_v20 = vsub.f32 %v1488_v6, %v935_v19 }
 0x2bf   : > { %v946_v21 = vmul.f32 1.442695, %v939_v20 }
 0x2c1   : > { %v1252_v22 = vpop.eup %1251  ;;  %1257 = vpow2.f32 %v946_v21 }
 0x2c2   : > { %v1254_v23 = vpop.eup %1253  ;;  %v951_v24 = vsel %vm923_vm7, %v1252_v22, 0.0 }
 0x2c3   : > { %952 = vadd.xlane.f32.xlu0 %v951_v24  ;;  %v948_v25 = vsel %vm923_vm7, %v1254_v23, 0.0 }
 0x2c4   : > { %949 = vadd.xlane.f32.xlu1 %v948_v25 }
 0x2ca   : > { %v1256_v26 = vpop.eup %1255 }
 0x2cb   : > { %v954_v27 = vsel %vm923_vm7, %v1256_v26, 0.0 }
 0x2cc   : > { %955 = vadd.xlane.f32.xlu1 %v954_v27 }
 0x2ce   : > { %v1258_v28 = vpop.eup %1257 }
 0x2cf   : > { %v957_v29 = vsel %vm923_vm7, %v1258_v28, 0.0 }
 0x2d0   : > { %958 = vadd.xlane.f32.xlu0 %v957_v29 }
 0x34c   : > { %v953_v30 = vpop.xlane.xlu0 %952 }
 0x34d   : > { %v950_v31 = vpop.xlane.xlu1 %949  ;;  %1259 = vlog2.f32 %v953_v30 }
 0x34e   : > { %1261 = vlog2.f32 %v950_v31 }
 0x355   : > { %v956_v32 = vpop.xlane.xlu1 %955 }
 0x356   : > { %1263 = vlog2.f32 %v956_v32 }
 0x359   : > { %v959_v33 = vpop.xlane.xlu0 %958 }
 0x35a   : > { %v1260_v34 = vpop.eup %1259  ;;  %1265 = vlog2.f32 %v959_v33 }
 0x35b   : > { %v1262_v35 = vpop.eup %1261  ;;  %v963_v37 = vmul.f32 0.6931472, %v1260_v34 }
 0x35c   : > { %v961_v36 = vmul.f32 0.6931472, %v1262_v35 }
 0x35d   : > { %v969_v39 = vadd.f32 %v963_v37, %v929_v10 }
 0x35e   : > { %v968_v38 = vadd.f32 %v961_v36, %v926_v12 }
 0x35f   : > { %v973_v42 = vsub.f32 %v969_v39, %v1476_v62 }
 0x360   : > { %v972_v41 = vsub.f32 %v968_v38, %v1478_v63 }
 0x361   : > { %v978_v49 = vsel %vm976_vm8, %v973_v42, 0.0 }
 0x362   : > { %v977_v48 = vsel %vm976_vm8, %v972_v41, 0.0 }
 0x363   : > { %v1264_v40 = vpop.eup %1263  ;;  %v979_v52 = vadd.f32 %v978_v49, %v977_v48 }
 0x364   : > { %v965_v43 = vmul.f32 0.6931472, %v1264_v40 }
 0x366   : > { %v970_v44 = vadd.f32 %v965_v43, %v932_v16 }
 0x367   : > { %v1266_v45 = vpop.eup %1265 }
 0x368   : > { %v967_v46 = vmul.f32 0.6931472, %v1266_v45  ;;  %v974_v47 = vsub.f32 %v970_v44, %v1484_v4 }
 0x36a   : > { %v971_v50 = vadd.f32 %v967_v46, %v935_v19  ;;  %v980_v51 = vsel %vm976_vm8, %v974_v47, 0.0 }
 0x36b   : > { %v981_v54 = vadd.f32 %v980_v51, %v979_v52 }
 0x36c   : > { %v975_v53 = vsub.f32 %v971_v50, %v1488_v6 }
 0x36e   : > { %v982_v55 = vsel %vm976_vm8, %v975_v53, 0.0 }
 0x36f   : > { %v983_v56 = vadd.f32 %v982_v55, %v981_v54 }
 0x371   : > { %984 = vadd.xlane.f32.xlu1 %v983_v56 }
 0x3fa   : > { %v985_v57 = vpop.xlane.xlu1 %984 }
 0x3fb   : > { %v986_v58 = vrot.slane %v985_v57, 4 }
 0x3fd   : > { %v987_v59 = vadd.f32 %v986_v58, %v985_v57 }
 0x3ff   : > { %v988_v60 = vrot.slane %v987_v59, 2 }
 0x401   : > { %v989_v61 = vadd.f32 %v988_v60, %v987_v59 }
 0x403   : > { %v990_v62 = vrot.slane %v989_v61, 1 }
 0x405   : > { %v991_v63 = vadd.f32 %v990_v62, %v989_v61 }
 0x407   : > { %1197 = vpush %v991_v63 }
 0x438   : > { %s1198_s20 = spop %1197 }
 0x439   : > { %v993_v0 = vstv %s1198_s20 }
 0x43a   : > { %994 = vst [vmem:[%s196_s11] sm:$0xff] %v993_v0 }
 0x43b   : > { %1280 = shalt.err (!%p1277_p3)
}
 0x43c   : > { %s1281_s4 = scalar_lea.hbm %s1007_s26, 128  ;;  %s1285_s7 = scalar_lea.hbm %s1547_s3, 256 }
 0x43d   : > { %p1282_p4 = scmp.ne.s32.totalorder %s1007_s26, %s1281_s4  ;;  %p1286_p9 = scmp.lt.s32.totalorder %s1007_s26, %s1547_s3 }
 0x43e   : > { %p1287_p10 = scmp.lt.s32.totalorder %s1285_s7, %s1281_s4 }
 0x43f   : > { %p1283_p7 = pnand %p1282_p4, %p1391_p5 }
 0x440   : > { %p1288_p11 = por %p1287_p10, %p1286_p9 }
 0x441   : > { %p1284_p8 = pneg %p1283_p7 }
 0x443   : > { %p1289_p12 = pnand %p1288_p11, %p1284_p8 }
 0x445   : > { %1292 = shalt.err (!%p1289_p12)
}
 0x446   : > { %1199 = dma.vmem_to_hbm [thread:$0]  (%p1391_p5), %s1506_s17, 128, %s1007_s26, %s996_s27  }
 0x447 PF: > { %p1205_p13 = scmp.ge.s32.totalorder %s1327_s15, 2  ;;  %s1021_s10 = sand.u32 1, %s1315_s12  }
 0x448   : > { %s1022_s11 = scalar_lea.sflag [#allocation3], %s1021_s10 }
 0x449   : > { %p1202_p0 = pnand %p1205_p13, %p1395_p6 }
 0x44b   : > { %p1203_p1 = pneg %p1202_p0 }
 0x44d   : > { %1310 = dma.done.wait (%p1203_p1), %s1022_s11, 128  }
 0x44e   : > { %1312 = vsyncadd (%p1203_p1), %s1022_s11, 4294967168  ;;  %p13_p2 = scmp.ge.s32.totalorder %s1378_s18, 4   ;;  %s1550_s12 = smov %s1319_s13 }
 0x44f   : > { %s1551_s13 = smov %s1323_s14  ;;  %s1552_s14 = smov %s1389_s21 }
 0x450   : > { %s1553_s15 = smov %s1378_s18  ;;  %15 = sbr.rel (!%p13_p2) target bundleno = 3 (0x3), region = 73 }
 0x455   :  { %1027 = vsyncpa [#allocation3], 1 }
 0x456   :  { %1029 = vsyncpa [#allocation3 + $0x1], 1 }

</bundles_post_ra>
